<compile_context>
chip_gen: v5e
topology: v5e:2x2
jax: 0.10.0
libtpu: 0.0.40
codegen_flags: <defaults>
</compile_context>

<pallas_src>
import functools
import math

import jax
import jax.numpy as jnp
from jax.experimental import pallas as pl
from jax.experimental.pallas import tpu as pltpu


def _round_up(x, m):
    return (x + m - 1) // m * m


def _device_vmem_bytes(default=128 << 20):
    try:
        v = int(getattr(pltpu.get_tpu_info(), "vmem_capacity_bytes", 0))
        return v if v > 0 else default
    except Exception:   # not on a TPU backend / older API
        return default


def _vmem_estimate(tile, in_p, out_p, num_bases):
    """Rough per-kernel VMEM footprint (bytes) for a given node tile."""
    tm = tk = tile
    est = 0
    est += 2 * tm * tk * 1                    # adj tile, int8, double-buffered
    est += 2 * tk * in_p * 2                  # x_src tile, bf16, double-buffered
    est += 1 * tm * in_p * 2                  # x_dst tile, bf16, single-buffered
    est += 1 * num_bases * in_p * out_p * 2   # basis, bf16, resident (1 buffer)
    est += 1 * in_p * out_p * 2               # loop weight, bf16, resident
    est += 2 * tm * out_p * 4                 # output tile, f32, double-buffered
    est += 1 * tm * in_p * 4                  # per-relation aggregate scratch, f32
    est += 1 << 20                            # bias + internal scratch headroom
    return est


def _choose_node_tiling(n, in_p, out_p, num_bases, budget, cap=1024):
    """Pick (n_pad, tile) with the biggest tile that fits `budget` bytes of VMEM."""
    cap = max(128, cap - cap % 128)
    n8 = _round_up(n, 8)
    if n8 <= cap and _vmem_estimate(n8, in_p, out_p, num_bases) <= budget:
        return n8, n8                          # single block: block dims == full dims (legal)
    best = None
    for t in range(128, cap + 1, 128):         # tiled: block extents multiples of (8, 128)
        if _vmem_estimate(t, in_p, out_p, num_bases) > budget:
            continue
        n_p = _round_up(n, t)
        key = (n_p, -t)                        # minimal padding first, then bigger tile
        if best is None or key < best[0]:
            best = (key, (n_p, t))
    if best is None:                           # last resort: smallest legal tile
        return _round_up(n, 128), 128
    return best[1]


# ----------------------------- Pallas kernel --------------------------------
def _rgcn_kernel(comp_ref, adj_ref, x_src_ref, x_dst_ref, basis_ref,
                 loopw_ref, bias_ref, out_ref, agg_ref, *, deg_lane):
    """grid = (dst_tile ['parallel'], relation ['arbitrary'], src_tile ['arbitrary'])."""
    r = pl.program_id(1)
    s = pl.program_id(2)
    num_r = pl.num_programs(1)
    num_s = pl.num_programs(2)
    num_bases = basis_ref.shape[0]

    # dst-tile prologue: seed the resident output with the self-loop term and the
    # bias, so the very last grid step only has to apply the activation.
    @pl.when(jnp.logical_and(r == 0, s == 0))
    def _():
        out_ref[...] = (jnp.dot(x_dst_ref[...], loopw_ref[...],
                                preferred_element_type=jnp.float32)
                        + bias_ref[...])

    # relation prologue: reset the per-relation message aggregate.
    @pl.when(s == 0)
    def _():
        agg_ref[...] = jnp.zeros_like(agg_ref)

    # message passing:  A_r[dst_tile, src_tile] @ X[src_tile]
    # adjacency streamed as int8 ({0,1}), upcast to bf16 in-register; MXU
    # accumulates in f32.  The 1.0 column at lane `deg_lane` of X makes
    # agg[:, deg_lane] the per-relation in-degree for free (no cast/row-sum).
    adj = adj_ref[...].astype(jnp.bfloat16)
    agg_ref[...] += jnp.dot(adj, x_src_ref[...],
                            preferred_element_type=jnp.float32)

    # relation epilogue: normalize (norm='right'), materialize
    # W_r = sum_b comp[r,b] * basis[b] and accumulate norm @ W_r into the
    # resident output.  Runs once per relation and overlaps the next
    # relation's adjacency DMAs.
    @pl.when(s == num_s - 1)
    def _():
        agg = agg_ref[...]
        deg = agg[:, deg_lane:deg_lane + 1]                        # (tm, 1) in-degree
        norm = (agg * (1.0 / jnp.maximum(deg, 1.0))).astype(jnp.bfloat16)
        w_r = comp_ref[r, 0] * basis_ref[0]                        # f32 accumulate on VPU
        for b in range(1, num_bases):                              # static unroll
            w_r = w_r + comp_ref[r, b] * basis_ref[b]
        out_ref[...] += jnp.dot(norm, w_r.astype(jnp.bfloat16),
                                preferred_element_type=jnp.float32)

    # dst-tile epilogue: activation (ReLU); dropout(p=0.0) is the identity.
    # TODO(synk): dropout with p > 0 would use pltpu.prng_seed / stateful_bernoulli.
    @pl.when(jnp.logical_and(r == num_r - 1, s == num_s - 1))
    def _():
        out_ref[...] = jnp.maximum(out_ref[...], 0.0)


# ------------------------------- wrapper -------------------------------------
def rel_graph_conv_layer(adj, x, w_comp, basis, loop_weight, h_bias, *, node_tile=None):
    """R-GCN layer forward.

    adj:         (R, N, N) dense adjacency, adj[r, d, s] = 1 iff edge s -> d of rel r.
    x:           (N, IN)   node features (f32).
    w_comp:      (R, B)    WeightBasis coefficients (f32).
    basis:       (B, IN, OUT) WeightBasis weights (f32).  For the no-basis path
                 (num_bases == num_rels) pass basis = weight and w_comp = eye(R).
    loop_weight: (IN, OUT) self-loop weight;  h_bias: (OUT,) bias.
    returns      (N, OUT)  f32.
    """
    R, N, _ = adj.shape
    IN = x.shape[1]
    B, _, OUT = basis.shape

    # Feature dims padded lane-dense.  One spare padded lane is always reserved
    # for the in-degree "ones" column (hence IN + 1 before rounding).
    # TODO(synk): when IN % 128 == 0 this reserves a full extra 128-lane block;
    #             an adj-row-sum fallback would avoid the extra X bandwidth.
    IN_P = _round_up(IN + 1, 128)
    OUT_P = _round_up(OUT, 128)
    DEG_LANE = IN

    vmem_cap = _device_vmem_bytes()
    vmem_limit = int(vmem_cap * 0.85)            # raise the scoped-VMEM default explicitly
    cap = 1024 if node_tile is None else node_tile
    N_P, tile = _choose_node_tiling(N, IN_P, OUT_P, B,
                                    budget=int(vmem_limit * 0.8), cap=cap)
    tm = tk = tile

    # int8 adjacency ({0,1} exact) halves the dominant HBM stream; X / weights
    # stream as bf16; all MXU accumulation stays f32.
    adj_p = jnp.pad(adj.astype(jnp.int8), ((0, 0), (0, N_P - N), (0, N_P - N)))
    x_p = jnp.pad(x.astype(jnp.bfloat16), ((0, N_P - N), (0, IN_P - IN)))
    x_p = x_p.at[:, DEG_LANE].set(1.0)           # in-degree column
    # padded rows of loop_weight / basis stay zero, so the degree column never
    # leaks into the output (its weight rows are all-zero).
    basis_p = jnp.pad(basis.astype(jnp.bfloat16),
                      ((0, 0), (0, IN_P - IN), (0, OUT_P - OUT)))
    loopw_p = jnp.pad(loop_weight.astype(jnp.bfloat16),
                      ((0, IN_P - IN), (0, OUT_P - OUT)))
    bias_p = jnp.pad(h_bias.astype(jnp.float32), ((0, OUT_P - OUT),)).reshape(1, OUT_P)
    comp = w_comp.astype(jnp.float32)

    grid = (N_P // tm, R, N_P // tk)
    resident = pl.Buffered(1)          # constant / dst-only index maps: no double-buffer

    out = pl.pallas_call(
        functools.partial(_rgcn_kernel, deg_lane=DEG_LANE),
        out_shape=jax.ShapeDtypeStruct((N_P, OUT_P), jnp.float32),
        grid_spec=pltpu.PrefetchScalarGridSpec(
            num_scalar_prefetch=0,
            grid=grid,
            in_specs=[
                # basis coefficients: tiny, scalar-read per relation -> SMEM.
                pl.BlockSpec(memory_space=pltpu.MemorySpace.SMEM),
                # A_r tile (dst_tile, src_tile) of relation r (int8, streamed).
                pl.BlockSpec((pl.Squeezed(), tm, tk), lambda d, r, s: (r, d, s)),
                # X rows of the src tile (message source features, streamed).
                pl.BlockSpec((tk, IN_P), lambda d, r, s: (s, 0)),
                # X rows of the dst tile (self-loop term); one buffer per dst tile.
                pl.BlockSpec((tm, IN_P), lambda d, r, s: (d, 0),
                             pipeline_mode=resident),
                # basis weights, self-loop weight, bias: VMEM-resident, single buffer.
                pl.BlockSpec((B, IN_P, OUT_P), lambda d, r, s: (0, 0, 0),
                             pipeline_mode=resident),
                pl.BlockSpec((IN_P, OUT_P), lambda d, r, s: (0, 0),
                             pipeline_mode=resident),
                pl.BlockSpec((1, OUT_P), lambda d, r, s: (0, 0),
                             pipeline_mode=resident),
            ],
            out_specs=pl.BlockSpec((tm, OUT_P), lambda d, r, s: (d, 0)),
            scratch_shapes=[
                pltpu.VMEM((tm, IN_P), jnp.float32),      # per-relation aggregate
            ],
        ),
        compiler_params=pltpu.CompilerParams(
            # dst tiles are independent -> 'parallel'; relation and src axes
            # reduce into the resident scratch/output -> 'arbitrary'.
            dimension_semantics=("parallel", "arbitrary", "arbitrary"),
            vmem_limit_bytes=vmem_limit),
    )(comp, adj_p, x_p, x_p, basis_p, loopw_p, bias_p)

    return out[:N, :OUT]


# --------------------------- parameter utilities -----------------------------
def xavier_uniform(key, shape, gain=1.0):
    """Matches nn.init.xavier_uniform_ (fan_in/fan_out over last two dims)."""
    fan_in, fan_out = shape[-2], shape[-1]
    a = gain * math.sqrt(6.0 / (fan_in + fan_out))
    return jax.random.uniform(key, shape, jnp.float32, minval=-a, maxval=a)


if __name__ == "__main__":
    key = jax.random.PRNGKey(0)
    k_adj, k_x, k_basis, k_comp, k_loop = jax.random.split(key, 5)

    # Small synthetic hetero-graph with one node type and R relations.
    R, N, IN, OUT, NUM_BASES = 4, 64, 48, 40, 2
    relu_gain = math.sqrt(2.0)  # nn.init.calculate_gain('relu')

    # dense adjacency: adj[r, dst, src] in {0, 1}
    adj = (jax.random.uniform(k_adj, (R, N, N)) < 0.25).astype(jnp.float32)
    x = jax.random.normal(k_x, (N, IN), jnp.float32)

    # WeightBasis (num_bases < num_rels): W_r = sum_b comp[r, b] * basis[b]
    basis = xavier_uniform(k_basis, (NUM_BASES, IN, OUT), gain=relu_gain)
    w_comp = xavier_uniform(k_comp, (R, NUM_BASES), gain=1.0)

    # self-loop weight and bias
    loop_weight = xavier_uniform(k_loop, (IN, OUT), gain=relu_gain)
    h_bias = jnp.zeros((OUT,), jnp.float32)          # nn.init.zeros_

    out = rel_graph_conv_layer(adj, x, w_comp, basis, loop_weight, h_bias)
    out = jax.block_until_ready(out)

    # pure-JAX reference mirroring the kernel's bf16-input / f32-accumulate math.
    f32, HI = jnp.float32, jax.lax.Precision.HIGHEST
    bf = lambda a: a.astype(jnp.bfloat16).astype(f32)
    adj_b, x_b, basis_b, loopw_b = bf(adj), bf(x), bf(basis), bf(loop_weight)

    deg = jnp.sum(adj_b, axis=-1, keepdims=True)                        # (R, N, 1)
    inv_deg = 1.0 / jnp.maximum(deg, 1.0)
    msg = jnp.einsum("rds,sf->rdf", adj_b, x_b, precision=HI)           # (R, N, IN)
    norm = bf(msg * inv_deg)                                            # bf16, like kernel
    w_r = bf(jnp.einsum("rb,bio->rio", w_comp, basis_b, precision=HI))  # (R, IN, OUT)
    hs = jnp.einsum("rdf,rfo->do", norm, w_r, precision=HI)
    ref = jnp.maximum(hs + jnp.dot(x_b, loopw_b, precision=HI) + h_bias, 0.0)

    assert out.shape == (N, OUT)
    err = float(jnp.max(jnp.abs(out - ref)))
    assert jnp.allclose(out, ref, atol=2e-3, rtol=2e-3), f"max abs err = {err}"

    print("KERNEL_OK")
</pallas_src>

<mosaic_0001>
module attributes {stable_mosaic.version = 11 : i64} {
  func.func @_rgcn_kernel(%arg0: i32, %arg1: i32, %arg2: i32, %arg3: memref<4x2xf32, #tpu.memory_space<smem>>, %arg4: memref<1x64x64xi8, #tpu.memory_space<vmem>>, %arg5: memref<64x128xbf16, #tpu.memory_space<vmem>>, %arg6: memref<64x128xbf16, #tpu.memory_space<vmem>>, %arg7: memref<2x128x128xbf16, #tpu.memory_space<vmem>>, %arg8: memref<128x128xbf16, #tpu.memory_space<vmem>>, %arg9: memref<1x128xf32, #tpu.memory_space<vmem>>, %arg10: memref<64x128xf32, #tpu.memory_space<vmem>>, %arg11: memref<64x128xf32, #tpu.memory_space<vmem>>) attributes {dimension_semantics = [#tpu.dimension_semantics<parallel>, #tpu.dimension_semantics<arbitrary>, #tpu.dimension_semantics<arbitrary>], iteration_bounds = array<i64: 1, 4, 1>, scalar_prefetch = 0 : i64, scratch_operands = 1 : i64, tpu.core_type = #tpu.core_type<tc>, window_params = [{transform_indices = @transform_0, window_bounds = array<i64: 4, 2>}, {transform_indices = @transform_1, window_bounds = array<i64: 1, 64, 64>}, {transform_indices = @transform_2, window_bounds = array<i64: 64, 128>}, {pipeline_mode = #tpu.pipeline_mode<synchronous>, transform_indices = @transform_3, window_bounds = array<i64: 64, 128>}, {pipeline_mode = #tpu.pipeline_mode<synchronous>, transform_indices = @transform_4, window_bounds = array<i64: 2, 128, 128>}, {pipeline_mode = #tpu.pipeline_mode<synchronous>, transform_indices = @transform_5, window_bounds = array<i64: 128, 128>}, {pipeline_mode = #tpu.pipeline_mode<synchronous>, transform_indices = @transform_6, window_bounds = array<i64: 1, 128>}, {transform_indices = @transform_7, window_bounds = array<i64: 64, 128>}]} {
    %c0_i32 = arith.constant 0 : i32
    %0 = arith.cmpi eq, %arg1, %c0_i32 : i32
    %c0_i32_0 = arith.constant 0 : i32
    %1 = arith.cmpi eq, %arg2, %c0_i32_0 : i32
    %2 = arith.andi %0, %1 : i1
    %3 = arith.extui %2 : i1 to i32
    %c0_i32_1 = arith.constant 0 : i32
    %4 = arith.cmpi ne, %3, %c0_i32_1 : i32
    scf.if %4 {
      %c0_16 = arith.constant 0 : index
      %c0_17 = arith.constant 0 : index
      %24 = vector.load %arg6[%c0_16, %c0_17] : memref<64x128xbf16, #tpu.memory_space<vmem>>, vector<64x128xbf16>
      %c0_18 = arith.constant 0 : index
      %c0_19 = arith.constant 0 : index
      %25 = vector.load %arg8[%c0_18, %c0_19] : memref<128x128xbf16, #tpu.memory_space<vmem>>, vector<128x128xbf16>
      %cst_20 = arith.constant dense<0.000000e+00> : vector<64x128xf32>
      %26 = tpu.matmul %24, %25, %cst_20 {dimension_numbers = #tpu.dot_dimension_numbers<[1], [0], [0], [1], [0, 0, 1, 1], [], []>} : vector<64x128xbf16>, vector<128x128xbf16>, vector<64x128xf32> -> vector<64x128xf32>
      %c0_21 = arith.constant 0 : index
      %c0_22 = arith.constant 0 : index
      %27 = vector.load %arg9[%c0_21, %c0_22] : memref<1x128xf32, #tpu.memory_space<vmem>>, vector<1x128xf32>
      %28 = vector.broadcast %27 : vector<1x128xf32> to vector<64x128xf32>
      %29 = arith.addf %26, %28 : vector<64x128xf32>
      %c0_23 = arith.constant 0 : index
      %c0_24 = arith.constant 0 : index
      %30 = vector.load %arg10[%c0_23, %c0_24] : memref<64x128xf32, #tpu.memory_space<vmem>>, vector<64x128xf32>
      tpu.vector_store %arg10[%c0_23, %c0_24], %29 {strides = array<i32>} : memref<64x128xf32, #tpu.memory_space<vmem>>, vector<64x128xf32>,
    } else {
    }
    %c0_i32_2 = arith.constant 0 : i32
    %5 = arith.cmpi eq, %arg2, %c0_i32_2 : i32
    %6 = arith.extui %5 : i1 to i32
    %c0_i32_3 = arith.constant 0 : i32
    %7 = arith.cmpi ne, %6, %c0_i32_3 : i32
    scf.if %7 {
      %cst_16 = arith.constant 0.000000e+00 : f32
      %24 = vector.broadcast %cst_16 : f32 to vector<64x128xf32>
      %c0_17 = arith.constant 0 : index
      %c0_18 = arith.constant 0 : index
      %25 = vector.load %arg11[%c0_17, %c0_18] : memref<64x128xf32, #tpu.memory_space<vmem>>, vector<64x128xf32>
      tpu.vector_store %arg11[%c0_17, %c0_18], %24 {strides = array<i32>} : memref<64x128xf32, #tpu.memory_space<vmem>>, vector<64x128xf32>,
    } else {
    }
    %c0 = arith.constant 0 : index
    %c0_4 = arith.constant 0 : index
    %c0_5 = arith.constant 0 : index
    %8 = vector.load %arg4[%c0, %c0_4, %c0_5] : memref<1x64x64xi8, #tpu.memory_space<vmem>>, vector<1x64x64xi8>
    %9 = vector.shape_cast %8 : vector<1x64x64xi8> to vector<64x64xi8>
    %10 = arith.sitofp %9 : vector<64x64xi8> to vector<64x64xbf16>
    %c0_6 = arith.constant 0 : index
    %c0_7 = arith.constant 0 : index
    %11 = vector.load %arg11[%c0_6, %c0_7] : memref<64x128xf32, #tpu.memory_space<vmem>>, vector<64x128xf32>
    %c0_8 = arith.constant 0 : index
    %c0_9 = arith.constant 0 : index
    %12 = vector.load %arg5[%c0_8, %c0_9] : memref<64x128xbf16, #tpu.memory_space<vmem>>, vector<64x128xbf16>
    %cst = arith.constant dense<0.000000e+00> : vector<64x128xf32>
    %13 = tpu.matmul %10, %12, %cst {dimension_numbers = #tpu.dot_dimension_numbers<[1], [0], [0], [1], [0, 0, 1, 1], [], []>} : vector<64x64xbf16>, vector<64x128xbf16>, vector<64x128xf32> -> vector<64x128xf32>
    %14 = arith.addf %11, %13 : vector<64x128xf32>
    %c0_10 = arith.constant 0 : index
    %c0_11 = arith.constant 0 : index
    %15 = vector.load %arg11[%c0_10, %c0_11] : memref<64x128xf32, #tpu.memory_space<vmem>>, vector<64x128xf32>
    tpu.vector_store %arg11[%c0_10, %c0_11], %14 {strides = array<i32>} : memref<64x128xf32, #tpu.memory_space<vmem>>, vector<64x128xf32>,
    %c0_i32_12 = arith.constant 0 : i32
    %16 = arith.cmpi eq, %arg2, %c0_i32_12 : i32
    %17 = arith.extui %16 : i1 to i32
    %c0_i32_13 = arith.constant 0 : i32
    %18 = arith.cmpi ne, %17, %c0_i32_13 : i32
    scf.if %18 {
      %c0_16 = arith.constant 0 : index
      %c0_17 = arith.constant 0 : index
      %24 = vector.load %arg11[%c0_16, %c0_17] : memref<64x128xf32, #tpu.memory_space<vmem>>, vector<64x128xf32>
      %25 = vector.extract_strided_slice %24 {offsets = [0, 48], sizes = [64, 1], strides = [1, 1]} : vector<64x128xf32> to vector<64x1xf32>
      %cst_18 = arith.constant 1.000000e+00 : f32
      %26 = vector.broadcast %cst_18 : f32 to vector<64x1xf32>
      %27 = arith.maximumf %25, %26 : vector<64x1xf32>
      %cst_19 = arith.constant 1.000000e+00 : f32
      %28 = vector.broadcast %cst_19 : f32 to vector<64x1xf32>
      %29 = arith.divf %28, %27 : vector<64x1xf32>
      %30 = vector.broadcast %29 : vector<64x1xf32> to vector<64x128xf32>
      %31 = arith.mulf %24, %30 : vector<64x128xf32>
      %32 = arith.truncf %31 : vector<64x128xf32> to vector<64x128xbf16>
      %33 = arith.index_cast %arg1 : i32 to index
      %c0_20 = arith.constant 0 : index
      %34 = memref.load %arg3[%33, %c0_20] : memref<4x2xf32, #tpu.memory_space<smem>>
      %c0_21 = arith.constant 0 : index
      %c0_22 = arith.constant 0 : index
      %c0_23 = arith.constant 0 : index
      %35 = vector.load %arg7[%c0_21, %c0_22, %c0_23] : memref<2x128x128xbf16, #tpu.memory_space<vmem>>, vector<1x128x128xbf16>
      %36 = vector.shape_cast %35 : vector<1x128x128xbf16> to vector<128x128xbf16>
      %37 = arith.extf %36 : vector<128x128xbf16> to vector<128x128xf32>
      %38 = vector.broadcast %34 : f32 to vector<128x128xf32>
      %39 = arith.mulf %38, %37 : vector<128x128xf32>
      %40 = arith.index_cast %arg1 : i32 to index
      %c1 = arith.constant 1 : index
      %41 = memref.load %arg3[%40, %c1] : memref<4x2xf32, #tpu.memory_space<smem>>
      %c1_24 = arith.constant 1 : index
      %c0_25 = arith.constant 0 : index
      %c0_26 = arith.constant 0 : index
      %42 = vector.load %arg7[%c1_24, %c0_25, %c0_26] : memref<2x128x128xbf16, #tpu.memory_space<vmem>>, vector<1x128x128xbf16>
      %43 = vector.shape_cast %42 : vector<1x128x128xbf16> to vector<128x128xbf16>
      %44 = arith.extf %43 : vector<128x128xbf16> to vector<128x128xf32>
      %45 = vector.broadcast %41 : f32 to vector<128x128xf32>
      %46 = arith.mulf %45, %44 : vector<128x128xf32>
      %47 = arith.addf %39, %46 : vector<128x128xf32>
      %c0_27 = arith.constant 0 : index
      %c0_28 = arith.constant 0 : index
      %48 = vector.load %arg10[%c0_27, %c0_28] : memref<64x128xf32, #tpu.memory_space<vmem>>, vector<64x128xf32>
      %49 = arith.truncf %47 : vector<128x128xf32> to vector<128x128xbf16>
      %cst_29 = arith.constant dense<0.000000e+00> : vector<64x128xf32>
      %50 = tpu.matmul %32, %49, %cst_29 {dimension_numbers = #tpu.dot_dimension_numbers<[1], [0], [0], [1], [0, 0, 1, 1], [], []>} : vector<64x128xbf16>, vector<128x128xbf16>, vector<64x128xf32> -> vector<64x128xf32>
      %51 = arith.addf %48, %50 : vector<64x128xf32>
      %c0_30 = arith.constant 0 : index
      %c0_31 = arith.constant 0 : index
      %52 = vector.load %arg10[%c0_30, %c0_31] : memref<64x128xf32, #tpu.memory_space<vmem>>, vector<64x128xf32>
      tpu.vector_store %arg10[%c0_30, %c0_31], %51 {strides = array<i32>} : memref<64x128xf32, #tpu.memory_space<vmem>>, vector<64x128xf32>,
    } else {
    }
    %c3_i32 = arith.constant 3 : i32
    %19 = arith.cmpi eq, %arg1, %c3_i32 : i32
    %c0_i32_14 = arith.constant 0 : i32
    %20 = arith.cmpi eq, %arg2, %c0_i32_14 : i32
    %21 = arith.andi %19, %20 : i1
    %22 = arith.extui %21 : i1 to i32
    %c0_i32_15 = arith.constant 0 : i32
    %23 = arith.cmpi ne, %22, %c0_i32_15 : i32
    scf.if %23 {
      %c0_16 = arith.constant 0 : index
      %c0_17 = arith.constant 0 : index
      %24 = vector.load %arg10[%c0_16, %c0_17] : memref<64x128xf32, #tpu.memory_space<vmem>>, vector<64x128xf32>
      %cst_18 = arith.constant 0.000000e+00 : f32
      %25 = vector.broadcast %cst_18 : f32 to vector<64x128xf32>
      %26 = arith.maximumf %24, %25 : vector<64x128xf32>
      %c0_19 = arith.constant 0 : index
      %c0_20 = arith.constant 0 : index
      %27 = vector.load %arg10[%c0_19, %c0_20] : memref<64x128xf32, #tpu.memory_space<vmem>>, vector<64x128xf32>
      tpu.vector_store %arg10[%c0_19, %c0_20], %26 {strides = array<i32>} : memref<64x128xf32, #tpu.memory_space<vmem>>, vector<64x128xf32>,
    } else {
    }
    return
  }
  func.func @transform_0(%arg0: i32, %arg1: i32, %arg2: i32) -> (i32, i32) {
    %c0_i32 = arith.constant 0 : i32
    %c0_i32_0 = arith.constant 0 : i32
    %c0_i32_1 = arith.constant 0 : i32
    return %c0_i32, %c0_i32_0 : i32, i32
  }
  func.func @transform_1(%arg0: i32, %arg1: i32, %arg2: i32) -> (i32, i32, i32) {
    %c0_i32 = arith.constant 0 : i32
    return %arg1, %arg0, %arg2 : i32, i32, i32
  }
  func.func @transform_2(%arg0: i32, %arg1: i32, %arg2: i32) -> (i32, i32) {
    %c0_i32 = arith.constant 0 : i32
    %c0_i32_0 = arith.constant 0 : i32
    return %arg2, %c0_i32 : i32, i32
  }
  func.func @transform_3(%arg0: i32, %arg1: i32, %arg2: i32) -> (i32, i32) {
    %c0_i32 = arith.constant 0 : i32
    %c0_i32_0 = arith.constant 0 : i32
    return %arg0, %c0_i32 : i32, i32
  }
  func.func @transform_4(%arg0: i32, %arg1: i32, %arg2: i32) -> (i32, i32, i32) {
    %c0_i32 = arith.constant 0 : i32
    %c0_i32_0 = arith.constant 0 : i32
    %c0_i32_1 = arith.constant 0 : i32
    %c0_i32_2 = arith.constant 0 : i32
    return %c0_i32, %c0_i32_0, %c0_i32_1 : i32, i32, i32
  }
  func.func @transform_5(%arg0: i32, %arg1: i32, %arg2: i32) -> (i32, i32) {
    %c0_i32 = arith.constant 0 : i32
    %c0_i32_0 = arith.constant 0 : i32
    %c0_i32_1 = arith.constant 0 : i32
    return %c0_i32, %c0_i32_0 : i32, i32
  }
  func.func @transform_6(%arg0: i32, %arg1: i32, %arg2: i32) -> (i32, i32) {
    %c0_i32 = arith.constant 0 : i32
    %c0_i32_0 = arith.constant 0 : i32
    %c0_i32_1 = arith.constant 0 : i32
    return %c0_i32, %c0_i32_0 : i32, i32
  }
  func.func @transform_7(%arg0: i32, %arg1: i32, %arg2: i32) -> (i32, i32) {
    %c0_i32 = arith.constant 0 : i32
    %c0_i32_0 = arith.constant 0 : i32
    return %arg0, %c0_i32 : i32, i32
  }
}

</mosaic_0001>

<bundles_post_ra>
// kernel: tpu_custom_call.1
= control target key start
LH: loop header
LB: loop body
LE: loop exit
PB: predicated region body
PF: predicated region fallthrough
CT: control target
= control target key end

     0   :  { %s2249_s0 = inlined_call_operand.vmem [shape: f32[4,2], index: 0, kind: input, shape index: {}]   ;;  %s2250_s1 = inlined_call_operand.hbm [shape: s8[4,64,64], index: 1, kind: input, shape index: {}]   ;;  %s2251_s2 = inlined_call_operand.hbm [shape: bf16[64,128], index: 2, kind: input, shape index: {}]   ;;  %s2252_s3 = inlined_call_operand.hbm [shape: bf16[64,128], index: 3, kind: input, shape index: {}]   ;;  %s2253_s4 = inlined_call_operand.hbm [shape: bf16[2,128,128], index: 4, kind: input, shape index: {}]   ;;  %s2254_s5 = inlined_call_operand.hbm [shape: bf16[128,128], index: 5, kind: input, shape index: {}]   ;;  %s2255_s6 = inlined_call_operand.vmem [shape: f32[1,128], index: 6, kind: input, shape index: {}]   ;;  %s2256_s7 = inlined_call_operand.hbm [shape: f32[64,128], index: 7, kind: output, shape index: {}]  }
   0x1   :  { %2258 = sst [smem:[#allocation20_spill]] %s2249_s0 }
   0x2   :  { %12 = vsyncpa [#allocation6], 0 }
   0x3   :  { %13 = vsyncpa [#allocation4], 0 }
   0x4   :  { %15 = vsyncpa [#allocation4 + $0x1], 0 }
   0x5   :  { %16 = vsyncpa [#allocation9], 0 }
   0x6   :  { %17 = vsyncpa [#allocation12], 0 }
   0x7   :  { %18 = vsyncpa [#allocation5], 0  ;;  %s1909_s24 = smov 0   ;;  %s1911_s25 = smov 0  }
   0x8   :  { %s1913_s26 = smov 0   ;;  %s1915_s27 = smov 0  }
   0x9   :  { %s1917_s28 = smov 0   ;;  %s1919_s29 = smov 0  }
   0xa LB: > { %s264_s9 = sshll.u32 %s2251_s2, 4  ;;  %s2257_s10 = sadd.s32 4294967295, %s1854_s29   ;;  %s1854_s29 = sphi %s1919_s29, %s24_s29   ;;  %s1850_s28 = sphi %s1917_s28, %s2282_s28   ;;  %s1846_s27 = sphi %s1915_s27, %s2281_s27   ;;  %s1842_s26 = sphi %s1913_s26, %s2280_s26   ;;  %s1838_s25 = sphi %s1911_s25, %s2279_s25   ;;  %s1834_s24 = sphi %s1909_s24, %s2278_s24   ;;  %s265_s9 = int_to_ptr.hbm [resolvable:$true] %s264_s9 }
   0xb   : > { %p1230_p0 = scmp.ge.s32.totalorder %s1854_s29, 1  ;;  %p1946_p1 = scmp.eq.s32.totalorder %s2257_s10, 0 }
   0xc   : > { %p240_p2 = scmp.lt.s32.totalorder %s1854_s29, 5  ;;  %s1856_s13 = smov [#allocation8]  }
   0xd   : > { %s266_s14 = sshll.u32 %s1856_s13, 4  ;;  %s295_s17 = sshll.u32 %s2253_s4, 4  ;;  %s267_s14 = int_to_ptr.vmem [resolvable:$true] %s266_s14  ;;  %s296_s17 = int_to_ptr.hbm [resolvable:$true] %s295_s17 }
   0xe   : > { %p1951_p3 = pnand %p1230_p0, %p240_p2  ;;  %s1857_s19 = smov [#allocation11]  }
   0xf   : > { %s297_s20 = sshll.u32 %s1857_s19, 4  ;;  %s1858_s21 = smov 64   ;;  %s298_s20 = int_to_ptr.vmem [resolvable:$true] %s297_s20 }
  0x10   : > { %p1481_p4 = pneg %p1951_p3  ;;  %s1859_s22 = smov 4  }
  0x11   : > { %s2262_s0 = sld [smem:[#allocation20_spill]]  ;;  %s281_s16 = sshll.u32 %s2252_s3, 4  ;;  %s282_s16 = int_to_ptr.hbm [resolvable:$true] %s281_s16 }
  0x12   : > { %p1962_p5 = pnand %p1481_p4, %p1946_p1  ;;  %s1860_s19 = smov [#allocation3]  }
  0x13   : > { %s309_s23 = sshll.u32 %s2254_s5, 4  ;;  %s1862_s30 = smov [#allocation13]   ;;  %s310_s23 = int_to_ptr.hbm [resolvable:$true] %s309_s23 }
  0x14   : > { %1487 = dma.hbm_to_vmem [thread:$0]  (!%p1962_p5), %s265_s9, 512, %s267_s14, [#allocation9], %s1858_s21, %s1858_s21, %s1859_s22  }
  0x15   : > { %1493 = dma.hbm_to_vmem [thread:$0]  (!%p1962_p5), %s296_s17, 2048, %s298_s20, [#allocation12], %s1858_s21, %s1858_s21, %s1859_s22  }
  0x16   : > { %s1861_s9 = smov [#allocation10]   ;;  %s39_s13 = sadd.s32 1, %s1850_s28 }
  0x17   : > { %s252_s8 = sshll.u32 %s2262_s0, 4  ;;  %s283_s14 = sshll.u32 %s1861_s9, 4  ;;  %s253_s8 = int_to_ptr.vmem [resolvable:$true] %s252_s8  ;;  %s284_s14 = int_to_ptr.vmem [resolvable:$true] %s283_s14 }
  0x18   : > { %1484 = dma.vmem_to_smem (!%p1962_p5), %s253_s8, 64, %s1860_s19, [#allocation6]  }
  0x19   : > { %1490 = dma.hbm_to_vmem [thread:$0]  (!%p1962_p5), %s282_s16, 512, %s284_s14, [#allocation9], %s1858_s21, %s1858_s21, %s1859_s22  }
  0x1a   : > { %s311_s8 = sshll.u32 %s1862_s30, 4  ;;  %p41_p6 = scmp.ge.s32.totalorder %s39_s13, 4  ;;  %s312_s8 = int_to_ptr.vmem [resolvable:$true] %s311_s8 }
  0x1b   : > { %1496 = dma.hbm_to_vmem [thread:$0]  (!%p1962_p5), %s310_s23, 1024, %s312_s8, [#allocation12], %s1858_s21, %s1858_s21, %s1859_s22  }
  0x1c   : > { %s75_s15 = sadd.s32 1, %s1842_s26  ;;  %p82_p7 = scmp.ne.s32.totalorder %s1842_s26, %s1838_s25 }
  0x1d   : > { %p83_p8 = scmp.eq.s32.totalorder %s1854_s29, 0  ;;  %s2284_s13 = smov (%p41_p6, %s39_s13), 0 }
  0x1e   : > { %p88_p10 = scmp.ne.s32.totalorder %s1838_s25, %s1834_s24  ;;  %s68_s16 = ssub.s32 %s1850_s28, %s2284_s13 }
  0x1f   : > { %p1992_p9 = por %p83_p8, %p82_p7  ;;  %p1506_p11 = scmp.lt.s32.totalorder %s1854_s29, 4 }
  0x20   : > { %p73_p12 = scmp.eq.s32.totalorder %s68_s16, 0  ;;  %p2003_p13 = por %p1946_p1, %p88_p10 }
  0x21   : > { %s328_s21 = sand.u32 1, %s1842_s26   ;;  %s1322_s22 = sshll.u32 %s1850_s28, 4 }
  0x22   : > { %s2010_s9 = scalar_select %p73_p12, %s1842_s26, %s75_s15  }
  0x23   : > { %s1237_s14 = sshll.u32 %s328_s21, 4  ;;  %s340_s23 = scalar_lea.hbm %s2250_s1, %s1322_s22 }
  0x24   : > { %s341_s30 = sshll.u32 %s340_s23, 4  ;;  %s332_s8 = scalar_lea.vmem [#allocation7], %s1237_s14  ;;  %s342_s30 = int_to_ptr.hbm [resolvable:$true] %s341_s30 }
  0x25   : > { %s343_s24 = sshll.u32 %s332_s8, 4  ;;  %p1498_p0 = pnand %p1506_p11, %p1992_p9  ;;  %s344_s24 = int_to_ptr.vmem [resolvable:$true] %s343_s24 }
  0x26   : > { %s329_s16 = scalar_lea.sflag [#allocation4], %s328_s21  ;;  %s1863_s10 = smov 128  }
  0x27   : > { %s1864_s0 = smov 8   ;;  %355 = sbr.rel (%p1951_p3) target bundleno = 719 (0x2cf), region = 48 }
  0x28   : > { %1500 = dma.hbm_to_vmem [thread:$0]  (!%p1498_p0), %s342_s30, 256, %s344_s24, %s329_s16, %s1863_s10, %s1863_s10, %s1864_s0  }
  0x2c   : > { %1813 = dma.done.wait (%p1946_p1), [#allocation6], 64  }
  0x2d   : > { %1815 = vsyncadd (%p1946_p1), [#allocation6], 4294967232  ;;  %s362_s15 = sand.u32 1, %s1838_s25  }
  0x2e   : > { %s2026_s22 = sshll.u32 %s362_s15, 4  ;;  %s363_s19 = scalar_lea.sflag [#allocation4], %s362_s15 }
  0x2f   : > { %s366_s21 = scalar_lea.vmem [#allocation7], %s2026_s22 }
  0x30   : > { %1817 = dma.done.wait (%p2003_p13), %s363_s19, 256  }
  0x31   : > { %1819 = vsyncadd (%p2003_p13), %s363_s19, 4294967040 }
  0x32   : > { %1821 = dma.done.wait (%p1946_p1), [#allocation9], 1024  }
  0x33   : > { %1823 = vsyncadd (%p1946_p1), [#allocation9], 4294966272 }
  0x34   : > { %1825 = dma.done.wait (%p1946_p1), [#allocation12], 3072  }
  0x35   : > { %1827 = vsyncadd (%p1946_p1), [#allocation12], 4294964224 }
  0x36   : > { %392 = sfence }
  0x37   : > { %p419_p2 = scmp.eq.s32.totalorder %s1846_s27, 0 }
  0x38   : > { %v1335_v0 = vld [vmem:[#allocation13 + $0x38] sm:$0xff] (%p419_p2)  ;;  %v1334_v1 = vld [vmem:[#allocation13 + $0x30] sm:$0xff] (%p419_p2)  ;;  %v1333_v2 = vld [vmem:[#allocation13 + $0x28] sm:$0xff] (%p419_p2) }
  0x39   : > { %424 = sbr.rel (!%p419_p2) target bundleno = 233 (0xe9), region = 76  ;;  %525 = vmatpush.bf16.msra.mxu0 (%p419_p2), %v1335_v0  ;;  %1419 = vmatpush.bf16.msra.mxu1 (%p419_p2), %v1335_v0  ;;  %v1332_v3 = vld [vmem:[#allocation13 + $0x20] sm:$0xff] (%p419_p2)  ;;  %v1331_v4 = vld [vmem:[#allocation13 + $0x18] sm:$0xff] (%p419_p2)  ;;  %v1330_v5 = vld [vmem:[#allocation13 + $0x10] sm:$0xff] (%p419_p2) }
  0x3a   : > { %1420 = vmatpush.bf16.msra.mxu2 (%p419_p2), %v1335_v0  ;;  %1421 = vmatpush.bf16.msra.mxu3 (%p419_p2), %v1335_v0  ;;  %v1329_v6 = vld [vmem:[#allocation13 + $0x8] sm:$0xff] (%p419_p2)  ;;  %v1328_v7 = vld [vmem:[#allocation13] sm:$0xff] (%p419_p2)  ;;  %v1326_v10 = vld [vmem:[#allocation10 + $0x10] sm:$0xff] (%p419_p2) }
  0x3b   : > { %v1324_v8 = vld [vmem:[#allocation10] sm:$0xff] (%p419_p2)  ;;  %v1325_v9 = vld [vmem:[#allocation10 + $0x8] sm:$0xff] (%p419_p2)  ;;  %v1327_v11 = vld [vmem:[#allocation10 + $0x18] sm:$0xff] (%p419_p2) }
  0x3c   : > { %v1575_v12 = vld [vmem:[%s2255_s6] ss:$0 sm:$0xff] (%p419_p2) }
  0x3d   : > { %526 = vmatpush.bf16.msra.mxu0 (%p419_p2), %v1334_v1  ;;  %1422 = vmatpush.bf16.msra.mxu1 (%p419_p2), %v1334_v1 }
  0x3e   : > { %1423 = vmatpush.bf16.msra.mxu2 %v1334_v1  ;;  %1424 = vmatpush.bf16.msra.mxu3 %v1334_v1 }
  0x41   : > { %527 = vmatpush.bf16.msra.mxu0 %v1333_v2  ;;  %1425 = vmatpush.bf16.msra.mxu1 %v1333_v2 }
  0x42   : > { %1426 = vmatpush.bf16.msra.mxu2 %v1333_v2  ;;  %1427 = vmatpush.bf16.msra.mxu3 %v1333_v2 }
  0x45   : > { %528 = vmatpush.bf16.msra.mxu0 %v1332_v3  ;;  %1428 = vmatpush.bf16.msra.mxu1 %v1332_v3 }
  0x46   : > { %1429 = vmatpush.bf16.msra.mxu2 %v1332_v3  ;;  %1430 = vmatpush.bf16.msra.mxu3 %v1332_v3 }
  0x49   : > { %529 = vmatpush.bf16.msra.mxu0 %v1331_v4  ;;  %1431 = vmatpush.bf16.msra.mxu1 %v1331_v4 }
  0x4a   : > { %1432 = vmatpush.bf16.msra.mxu2 %v1331_v4  ;;  %1433 = vmatpush.bf16.msra.mxu3 %v1331_v4 }
  0x4d   : > { %530 = vmatpush.bf16.msra.mxu0 %v1330_v5  ;;  %1434 = vmatpush.bf16.msra.mxu1 %v1330_v5 }
  0x4e   : > { %1435 = vmatpush.bf16.msra.mxu2 %v1330_v5  ;;  %1436 = vmatpush.bf16.msra.mxu3 %v1330_v5 }
  0x51   : > { %531 = vmatpush.bf16.msra.mxu0 %v1329_v6  ;;  %1437 = vmatpush.bf16.msra.mxu1 %v1329_v6 }
  0x52   : > { %1438 = vmatpush.bf16.msra.mxu2 %v1329_v6  ;;  %1439 = vmatpush.bf16.msra.mxu3 %v1329_v6 }
  0x55   : > { %532 = vmatpush.bf16.msra.mxu0 %v1328_v7  ;;  %1440 = vmatpush.bf16.msra.mxu1 %v1328_v7 }
  0x56   : > { %1441 = vmatpush.bf16.msra.mxu2 %v1328_v7  ;;  %1442 = vmatpush.bf16.msra.mxu3 %v1328_v7 }
  0x58   : > { %533 = vmatmul.bf16.vlgmr.msra.gmra.mxu0 %v1324_v8  ;;  %538 = vmatmul.bf16.vlgmr.msra.gmra.mxu1 %v1325_v9 }
  0x59   : > { %543 = vmatmul.bf16.vlgmr.msra.gmra.mxu2 %v1326_v10  ;;  %548 = vmatmul.bf16.vlgmr.msra.gmra.mxu3 %v1327_v11 }
  0xd5   : > { %v534_v13 = vpop.f32.mrf.mxu0  ;;  %v539_v14 = vpop.f32.mrf.mxu1 }
  0xd6   : > { %v535_v15 = vadd.f32 %v1575_v12, %v534_v13  ;;  %v540_v16 = vadd.f32 %v1575_v12, %v539_v14 }
  0xd8   : > { %554 = vst [vmem:[#allocation14] sm:$0xff] %v535_v15 }
  0xd9   : > { %556 = vst [vmem:[#allocation14 + $0x10] sm:$0xff] %v540_v16 }
  0xdc   : > { %v544_v17 = vpop.f32.mrf.mxu2  ;;  %v549_v18 = vpop.f32.mrf.mxu3 }
  0xdd   : > { %v545_v19 = vadd.f32 %v1575_v12, %v544_v17  ;;  %v550_v20 = vadd.f32 %v1575_v12, %v549_v18  ;;  %v536_v21 = vpop.f32.mrf.mxu0  ;;  %v541_v22 = vpop.f32.mrf.mxu1 }
  0xde   : > { %v537_v23 = vadd.f32 %v1575_v12, %v536_v21  ;;  %v542_v24 = vadd.f32 %v1575_v12, %v541_v22 }
  0xdf   : > { %558 = vst [vmem:[#allocation14 + $0x20] sm:$0xff] %v545_v19 }
  0xe0   : > { %560 = vst [vmem:[#allocation14 + $0x30] sm:$0xff] %v550_v20 }
  0xe1   : > { %555 = vst [vmem:[#allocation14 + $0x8] sm:$0xff] %v537_v23 }
  0xe2   : > { %557 = vst [vmem:[#allocation14 + $0x18] sm:$0xff] %v542_v24 }
  0xe4   : > { %v546_v25 = vpop.f32.mrf.mxu2  ;;  %v551_v26 = vpop.f32.mrf.mxu3 }
  0xe5   : > { %v547_v27 = vadd.f32 %v1575_v12, %v546_v25  ;;  %v552_v28 = vadd.f32 %v1575_v12, %v551_v26 }
  0xe7   : > { %559 = vst [vmem:[#allocation14 + $0x28] sm:$0xff] %v547_v27 }
  0xe8   : > { %561 = vst [vmem:[#allocation14 + $0x38] sm:$0xff] %v552_v28 }
  0xe9 PF: > { %v1339_v29 = vld [vmem:[#allocation8 + $0x18] sm:$0xff]  ;;  %v1338_v30 = vld [vmem:[#allocation8 + $0x10] sm:$0xff]  ;;  %v1337_v36 = vld [vmem:[#allocation8 + $0x8] sm:$0xff]  ;;  %vm635_vm0 = vcmask 523264   ;;  %v1865_v55 = vmov 48   ;;  %s1316_s11 = sshll.u32 %s1846_s27, 7 }
  0xea   : > { %652 = vmatpush.bf16.msra.mxu0 %v1339_v29  ;;  %1443 = vmatpush.bf16.msra.mxu3 %v1339_v29  ;;  %v573_v31 = vld [vmem:[%s366_s21] sm:$0xff]  ;;  %v574_v44 = vld [vmem:[%s366_s21 + $0x8] sm:$0xff]  ;;  %s935_s12 = sadd.s32 1, %s1316_s11  ;;  %s2075_s18 = sld [smem:[#allocation3 + %s1316_s11]] }
  0xeb   : > { %v575_v32 = vunpack.c.0.s8 %v573_v31  ;;  %v576_v33 = vunpack.c.1.s8 %v573_v31  ;;  %v577_v34 = vunpack.c.2.s8 %v573_v31  ;;  %v578_v35 = vunpack.c.3.s8 %v573_v31  ;;  %v1336_v41 = vld [vmem:[#allocation8] sm:$0xff]  ;;  %1577 = vset.pattern.permute.xlu1 %v1865_v55  ;;  %1576 = vset.pattern.permute.xlu0 %v1865_v55  ;;  %s2077_s14 = sld [smem:[#allocation3 + %s935_s12]]  ;;  %p1064_p1 = scmp.eq.s32.totalorder %s1846_s27, 3 }
  0xec   : > { %v579_v45 = vunpack.c.0.s8 %v574_v44  ;;  %v580_v46 = vunpack.c.1.s8 %v574_v44  ;;  %v581_v50 = vunpack.c.2.s8 %v574_v44  ;;  %v582_v51 = vunpack.c.3.s8 %v574_v44  ;;  %1578 = vset.pattern.permute.xlu2 %v1865_v55 }
  0xed   : > { %v583_v37 = vcvt.s32.f32 %v575_v32  ;;  %v584_v38 = vcvt.s32.f32 %v576_v33  ;;  %v585_v39 = vcvt.s32.f32 %v577_v34  ;;  %v586_v40 = vcvt.s32.f32 %v578_v35 }
  0xee   : > { %653 = vmatpush.bf16.msra.mxu0 %v1338_v30  ;;  %1444 = vmatpush.bf16.msra.mxu3 %v1338_v30  ;;  %v587_v47 = vcvt.s32.f32 %v579_v45  ;;  %v588_v48 = vcvt.s32.f32 %v580_v46  ;;  %v589_v52 = vcvt.s32.f32 %v581_v50  ;;  %v590_v53 = vcvt.s32.f32 %v582_v51  ;;  %v1418_v51 = vld [vmem:[#allocation11 + $0x78] sm:$0xff]  }
  0xef   : > { %v591_v42 = vpack.c.bf16 %v584_v38, %v583_v37  ;;  %v592_v43 = vpack.c.bf16 %v586_v40, %v585_v39 }
  0xf0   : > { %v593_v49 = vpack.c.bf16 %v588_v48, %v587_v47  ;;  %v594_v54 = vpack.c.bf16 %v590_v53, %v589_v52  ;;  %v2108_v50 = vstv %s2075_s18  ;;  %v1410_v53 = vld [vmem:[#allocation11 + $0x30] sm:$0xff]  }
  0xf1   : > { %v2111_v52 = vstv %s2077_s14 }
  0xf2   : > { %654 = vmatpush.bf16.msra.mxu0 %v1337_v36  ;;  %1445 = vmatpush.bf16.msra.mxu3 %v1337_v36 }
  0xf6   : > { %655 = vmatpush.bf16.msra.mxu0 %v1336_v41  ;;  %1446 = vmatpush.bf16.msra.mxu3 %v1336_v41 }
  0xf9   : > { %1312 = vmatmul.msk.bf16.vlgmr.msra.gmra.mxu0 %vm635_vm0, %v591_v42  ;;  %1313 = vmatmul.msk.bf16.vlgmr.msra.gmra.mxu3 %vm635_vm0, %v592_v43 }
 0x109   : > { %1314 = vmatmul.msk.bf16.gmra.mxu3 %vm635_vm0, %v593_v49  ;;  %v1411_v49 = vld [vmem:[#allocation11 + $0x38] sm:$0xff]  }
 0x10a   : > { %v1371_v55 = vunpack.c.l.bf16 %v1411_v49 }
 0x119   : > { %1315 = vmatmul.msk.bf16.gmra.mxu3 %vm635_vm0, %v594_v54 }
 0x176   : > { %v2049_v56 = vpop.f32.mrf.mxu0 }
 0x177   : > { %v704_v57 = vmax.f32 %v2049_v56, 1.0 }
 0x179   : > { %1579 = vrcp.f32 %v704_v57  ;;  %vm717_vm1 = vweird.f32 %v704_v57  ;;  %v723_v0 = vand.u32 2147483648, %v704_v57  ;;  %v721_v2 = vand.u32 2147483647, %v704_v57 }
 0x17b   : > { %v724_v6 = vor.u32 1.1754944e-38, %v723_v0  ;;  %vm722_vm4 = vcmp.eq.f32.partialorder %v721_v2, 8.507059e+37  ;;  %v1404_v0 = vunpack.c.h.bf16 %v1418_v51  ;;  %v933_v2 = vmul.f32 %v1371_v55, %v2108_v50 }
 0x17c   : > { %v2052_v58 = vpop.f32.mrf.mxu3 }
 0x17d   : > { %v2055_v59 = vmax.f32 %v2052_v58, 1.0 }
 0x17e   : > { %v2057_v60 = vpop.f32.mrf.mxu0 }
 0x17f   : > { %v1580_v61 = vpop.eup %1579  ;;  %v705_v62 = vmax.f32 %v2057_v60, 1.0  ;;  %v753_v28 = vand.u32 2147483648, %v2055_v59  ;;  %v751_v40 = vand.u32 2147483647, %v2055_v59 }
 0x180   : > { %v713_v63 = vmul.f32 %v1580_v61, %v704_v57  ;;  %vm718_vm2 = vweird.f32 %v1580_v61  ;;  %v1372_v57 = vunpack.c.h.bf16 %v1411_v49 }
 0x181   : > { %1581 = vrcp.f32 %v705_v62  ;;  %vm719_vm3 = vmor %vm717_vm1, %vm718_vm2  ;;  %v738_v13 = vand.u32 2147483648, %v705_v62  ;;  %vm732_vm5 = vweird.f32 %v705_v62  ;;  %v736_v15 = vand.u32 2147483647, %v705_v62 }
 0x182   : > { %1583 = vrcp.f32 %v2055_v59  ;;  %v714_v1 = vsub.f32 1.0, %v713_v63  ;;  %v2093_v41 = vor.u32 1.1754944e-38, %v753_v28 }
 0x183   : > { %v739_v21 = vor.u32 1.1754944e-38, %v738_v13  ;;  %vm737_vm8 = vcmp.eq.f32.partialorder %v736_v15, 8.507059e+37 }
 0x184   : > { %v2061_v3 = vpop.f32.mrf.mxu3  ;;  %v715_v4 = vmul.f32 %v1580_v61, %v714_v1  ;;  %v1367_v1 = vunpack.c.l.bf16 %v1410_v53 }
 0x185   : > { %v707_v5 = vmax.f32 %v2061_v3, 1.0 }
 0x186   : > { %v716_v7 = vadd.f32 %v1580_v61, %v715_v4  ;;  %v934_v4 = vmul.f32 %v1372_v57, %v2108_v50 }
 0x187   : > { %v1582_v8 = vpop.eup %1581  ;;  %1585 = vrcp.f32 %v707_v5  ;;  %v766_v30 = vand.u32 2147483647, %v707_v5  ;;  %v768_v31 = vand.u32 2147483648, %v707_v5  ;;  %vm762_vm10 = vweird.f32 %v707_v5 }
 0x188   : > { %v2064_v9 = vpop.eup %1583  ;;  %v720_v10 = vsel %vm719_vm3, %v1580_v61, %v716_v7  ;;  %v728_v11 = vmul.f32 %v1582_v8, %v705_v62  ;;  %vm733_vm6 = vweird.f32 %v1582_v8  ;;  %v1403_v61 = vunpack.c.l.bf16 %v1418_v51  ;;  %v1417_v62 = vld [vmem:[#allocation11 + $0x70] sm:$0xff]  }
 0x189   : > { %v725_v12 = vsel %vm722_vm4, %v724_v6, %v720_v10  ;;  %v743_v16 = vmul.f32 %v2064_v9, %v2055_v59  ;;  %vm734_vm7 = vmor %vm732_vm5, %vm733_vm6  ;;  %vm767_vm12 = vcmp.eq.f32.partialorder %v766_v30, 8.507059e+37  ;;  %v769_v43 = vor.u32 1.1754944e-38, %v768_v31 }
 0x18a   : > { %834 = vperm.xlu1 %1577, %v725_v12   ;;  %v729_v14 = vsub.f32 1.0, %v728_v11  ;;  %v1368_v6 = vunpack.c.h.bf16 %v1410_v53  ;;  %v986_v11 = vmul.f32 %v1404_v0, %v2111_v52  ;;  %v1399_v12 = vunpack.c.l.bf16 %v1417_v62 }
 0x18b   : > { %v744_v24 = vsub.f32 1.0, %v743_v16  ;;  %vm748_vm1 = vweird.f32 %v2064_v9  ;;  %vm747_vm3 = vweird.f32 %v2055_v59  ;;  %vm2147_vm6 = vcmp.eq.f32.partialorder %v751_v40, 8.507059e+37 }
 0x18c   : > { %v2069_v17 = vpop.f32.mrf.mxu3  ;;  %v730_v18 = vmul.f32 %v1582_v8, %v729_v14  ;;  %v983_v30 = vmul.f32 %v1399_v12, %v2111_v52 }
 0x18d   : > { %v1586_v19 = vpop.eup %1585  ;;  %v2072_v20 = vmax.f32 %v2069_v17, 1.0  ;;  %v745_v33 = vmul.f32 %v2064_v9, %v744_v24  ;;  %v1409_v24 = vld [vmem:[#allocation11 + $0x28] sm:$0xff]  }
 0x18e   : > { %v731_v22 = vadd.f32 %v1582_v8, %v730_v18  ;;  %v758_v23 = vmul.f32 %v1586_v19, %v707_v5  ;;  %vm763_vm9 = vweird.f32 %v1586_v19  ;;  %v985_v5 = vmul.f32 %v1403_v61, %v2111_v52 }
 0x18f   : > { %1587 = vrcp.f32 %v2072_v20  ;;  %v781_v32 = vand.u32 2147483647, %v2072_v20  ;;  %v783_v36 = vand.u32 2147483648, %v2072_v20  ;;  %vm2088_vm11 = vmor %vm762_vm10, %vm763_vm9  ;;  %vm777_vm13 = vweird.f32 %v2072_v20 }
 0x190   : > { %v735_v25 = vsel %vm734_vm7, %v1582_v8, %v731_v22  ;;  %v759_v26 = vsub.f32 1.0, %v758_v23  ;;  %v2105_v46 = vadd.f32 %v2064_v9, %v745_v33  ;;  %v1001_v16 = vadd.f32 %v985_v5, %v933_v2  ;;  %vm2170_vm9 = vmor %vm747_vm3, %vm748_vm1 }
 0x191   : > { %v740_v27 = vsel %vm737_vm8, %v739_v21, %v735_v25  ;;  %vm2100_vm14 = vcmp.eq.f32.partialorder %v781_v32, 8.507059e+37  ;;  %v784_v48 = vor.u32 1.1754944e-38, %v783_v36  ;;  %v1400_v18 = vunpack.c.h.bf16 %v1417_v62  ;;  %v1408_v36 = vld [vmem:[#allocation11 + $0x20] sm:$0xff]  }
 0x192   : > { %839 = vperm.xlu1 %1577, %v740_v27   ;;  %v760_v29 = vmul.f32 %v1586_v19, %v759_v26  ;;  %v1002_v22 = vadd.f32 %v986_v11, %v934_v4  ;;  %v931_v23 = vmul.f32 %v1367_v1, %v2108_v50  ;;  %v1416_v26 = vld [vmem:[#allocation11 + $0x68] sm:$0xff]   ;;  %v1363_v33 = vunpack.c.l.bf16 %v1409_v24 }
 0x193   : > { %v984_v32 = vmul.f32 %v1400_v18, %v2111_v52  ;;  %v1359_v55 = vunpack.c.l.bf16 %v1408_v36  ;;  %v1360_v57 = vunpack.c.h.bf16 %v1408_v36 }
 0x194   : > { %v2082_v34 = vpop.f32.mrf.mxu3  ;;  %v761_v35 = vadd.f32 %v1586_v19, %v760_v29  ;;  %v1018_v29 = vpack.c.bf16 %v1002_v22, %v1001_v16  ;;  %v999_v39 = vadd.f32 %v983_v30, %v931_v23  ;;  %v929_v45 = vmul.f32 %v1363_v33, %v2108_v50 }
 0x195   : > { %v1588_v37 = vpop.eup %1587  ;;  %v2086_v38 = vmax.f32 %v2082_v34, 1.0  ;;  %v750_v16 = vsel %vm2170_vm9, %v2064_v9, %v2105_v46  ;;  %v928_v18 = vmul.f32 %v1360_v57, %v2108_v50 }
 0x196   : > { %v765_v42 = vsel %vm2088_vm11, %v1586_v19, %v761_v35  ;;  %v773_v44 = vmul.f32 %v1588_v37, %v2072_v20  ;;  %vm778_vm15 = vweird.f32 %v1588_v37  ;;  %v932_v20 = vmul.f32 %v1368_v6, %v2108_v50  ;;  %1019 = vmatpush.bf16.msra.mxu1 %v1018_v29  ;;  %1447 = vmatpush.bf16.msra.mxu2 %v1018_v29 }
 0x197   : > { %1589 = vrcp.f32 %v2086_v38  ;;  %v770_v54 = vsel %vm767_vm12, %v769_v43, %v765_v42  ;;  %v796_v10 = vand.u32 2147483647, %v2086_v38  ;;  %vm779_vm0 = vmor %vm777_vm13, %vm778_vm15  ;;  %v798_v15 = vand.u32 2147483648, %v2086_v38  ;;  %v1415_v43 = vld [vmem:[#allocation11 + $0x60] sm:$0xff]  }
 0x198   : > { %v774_v47 = vsub.f32 1.0, %v773_v44  ;;  %vm792_vm2 = vweird.f32 %v2086_v38  ;;  %v1364_v35 = vunpack.c.h.bf16 %v1409_v24  ;;  %v1395_v42 = vunpack.c.l.bf16 %v1416_v26 }
 0x199   : > { %vm2135_vm4 = vcmp.eq.f32.partialorder %v796_v10, 8.507059e+37  ;;  %v799_v31 = vor.u32 1.1754944e-38, %v798_v15  ;;  %v1000_v44 = vadd.f32 %v984_v32, %v932_v20  ;;  %v1391_v1 = vunpack.c.l.bf16 %v1415_v43  ;;  %v1414_v15 = vld [vmem:[#allocation11 + $0x58] sm:$0xff]  }
 0x19a   : > { %849 = vperm.xlu1 %1577, %v770_v54   ;;  %v775_v63 = vmul.f32 %v1588_v37, %v774_v47  ;;  %v930_v47 = vmul.f32 %v1364_v35, %v2108_v50  ;;  %v981_v54 = vmul.f32 %v1395_v42, %v2111_v52  ;;  %v1387_v9 = vunpack.c.l.bf16 %v1414_v15 }
 0x19b   : > { %v979_v59 = vmul.f32 %v1391_v1, %v2111_v52  ;;  %v1388_v29 = vunpack.c.h.bf16 %v1414_v15 }
 0x19c   : > { %v2116_v7 = vpop.f32.mrf.mxu3  ;;  %v776_v8 = vadd.f32 %v1588_v37, %v775_v63  ;;  %v1017_v63 = vpack.c.bf16 %v1000_v44, %v999_v39  ;;  %v997_v5 = vadd.f32 %v981_v54, %v929_v45  ;;  %v977_v33 = vmul.f32 %v1387_v9, %v2111_v52 }
 0x19d   : > { %v1590_v13 = vpop.eup %1589  ;;  %v2121_v14 = vmax.f32 %v2116_v7, 1.0 }
 0x19e   : > { %v780_v19 = vsel %vm779_vm0, %v1588_v37, %v776_v8  ;;  %v788_v21 = vmul.f32 %v1590_v13, %v2086_v38  ;;  %vm793_vm5 = vweird.f32 %v1590_v13  ;;  %1020 = vmatpush.bf16.msra.mxu1 %v1017_v63  ;;  %v1407_v8 = vld [vmem:[#allocation11 + $0x18] sm:$0xff]   ;;  %1448 = vmatpush.bf16.msra.mxu2 %v1017_v63  ;;  %v1413_v63 = vld [vmem:[#allocation11 + $0x50] sm:$0xff]  }
 0x19f   : > { %1591 = vrcp.f32 %v2121_v14  ;;  %v785_v25 = vsel %vm2100_vm14, %v784_v48, %v780_v19  ;;  %v1396_v48 = vunpack.c.h.bf16 %v1416_v26  ;;  %vm794_vm7 = vmor %vm792_vm2, %vm793_vm5  ;;  %v813_v4 = vand.u32 2147483648, %v2121_v14 }
 0x1a0   : > { %854 = vperm.xlu0 %1576, %v785_v25   ;;  %v789_v27 = vsub.f32 1.0, %v788_v21  ;;  %vm807_vm8 = vweird.f32 %v2121_v14  ;;  %v811_v38 = vand.u32 2147483647, %v2121_v14  ;;  %v1392_v19 = vunpack.c.h.bf16 %v1415_v43 }
 0x1a1   : > { %v982_v0 = vmul.f32 %v1396_v48, %v2111_v52  ;;  %v814_v22 = vor.u32 1.1754944e-38, %v813_v4  ;;  %v1355_v24 = vunpack.c.l.bf16 %v1407_v8 }
 0x1a2   : > { %v790_v37 = vmul.f32 %v1590_v13, %v789_v27  ;;  %v980_v20 = vmul.f32 %v1392_v19, %v2111_v52  ;;  %v1356_v27 = vunpack.c.h.bf16 %v1407_v8  ;;  %vm812_vm12 = vcmp.eq.f32.partialorder %v811_v38, 8.507059e+37  ;;  %v1405_v38 = vld [vmem:[#allocation11 + $0x8] sm:$0xff]  }
 0x1a3   : > { %v998_v12 = vadd.f32 %v982_v0, %v930_v47  ;;  %v925_v28 = vmul.f32 %v1355_v24, %v2108_v50  ;;  %v1412_v8 = vld [vmem:[#allocation11 + $0x48] sm:$0xff]   ;;  %v1374_v24 = vld [vmem:[#allocation11 + $0x40] sm:$0xff]  }
 0x1a4   : > { %v2143_v49 = vpop.f32.mrf.mxu3  ;;  %v791_v51 = vadd.f32 %v1590_v13, %v790_v37  ;;  %v926_v32 = vmul.f32 %v1356_v27, %v2108_v50  ;;  %v978_v37 = vmul.f32 %v1388_v29, %v2111_v52  ;;  %v1379_v15 = vunpack.c.l.bf16 %v1412_v8 }
 0x1a5   : > { %v1592_v61 = vpop.eup %1591  ;;  %v2153_v62 = vmax.f32 %v2143_v49, 1.0  ;;  %v1016_v23 = vpack.c.bf16 %v998_v12, %v997_v5  ;;  %v993_v44 = vadd.f32 %v977_v33, %v925_v28  ;;  %v1347_v12 = vunpack.c.l.bf16 %v1405_v38 }
 0x1a6   : > { %v795_v40 = vsel %vm794_vm7, %v1590_v13, %v791_v51  ;;  %v803_v2 = vmul.f32 %v1592_v61, %v2121_v14  ;;  %vm808_vm10 = vweird.f32 %v1592_v61  ;;  %v927_v13 = vmul.f32 %v1359_v55, %v2108_v50 }
 0x1a7   : > { %1593 = vrcp.f32 %v2153_v62  ;;  %v800_v6 = vsel %vm2135_vm4, %v799_v31, %v795_v40  ;;  %vm2183_vm11 = vmor %vm807_vm8, %vm808_vm10  ;;  %1021 = vmatpush.bf16.msra.mxu1 %v1016_v23  ;;  %1449 = vmatpush.bf16.msra.mxu2 %v1016_v23  ;;  %v755_v14 = vsel %vm2147_vm6, %v2093_v41, %v750_v16  ;;  %v996_v31 = vadd.f32 %v980_v20, %v928_v18  ;;  %v1342_v23 = vld [vmem:[#allocation11] sm:$0xff]  }
 0x1a8   : > { %859 = vperm.xlu0 %1576, %v800_v6   ;;  %v804_v11 = vsub.f32 1.0, %v803_v2  ;;  %v995_v26 = vadd.f32 %v979_v59, %v927_v13  ;;  %vm822_vm13 = vweird.f32 %v2153_v62  ;;  %v828_v42 = vand.u32 2147483648, %v2153_v62 }
 0x1a9   : > { %v826_v45 = vand.u32 2147483647, %v2153_v62  ;;  %v994_v47 = vadd.f32 %v978_v37, %v926_v32  ;;  %v1383_v40 = vunpack.c.l.bf16 %v1413_v63  ;;  %v1384_v2 = vunpack.c.h.bf16 %v1413_v63 }
 0x1aa   : > { %v805_v21 = vmul.f32 %v1592_v61, %v804_v11  ;;  %v1015_v43 = vpack.c.bf16 %v996_v31, %v995_v26  ;;  %v829_v53 = vor.u32 1.1754944e-38, %v828_v42  ;;  %v1348_v13 = vunpack.c.h.bf16 %v1405_v38 }
 0x1ab   : > { %v1014_v51 = vpack.c.bf16 %v994_v47, %v993_v44  ;;  %vm827_vm0 = vcmp.eq.f32.partialorder %v826_v45, 8.507059e+37  ;;  %v976_v6 = vmul.f32 %v1384_v2, %v2111_v52  ;;  %v1380_v16 = vunpack.c.h.bf16 %v1412_v8  ;;  %v1005_v2 = vld [vmem:[#allocation14 + $0x10] sm:$0xff] }
 0x1ac   : > { %v806_v46 = vadd.f32 %v1592_v61, %v805_v21  ;;  %1022 = vmatpush.bf16.msra.mxu1 %v1015_v43  ;;  %1450 = vmatpush.bf16.msra.mxu2 %v1015_v43  ;;  %v921_v19 = vmul.f32 %v1347_v12, %v2108_v50  ;;  %v922_v59 = vmul.f32 %v1348_v13, %v2108_v50  ;;  %v1343_v25 = vunpack.c.l.bf16 %v1342_v23 }
 0x1ad   : > { %v1594_v30 = vpop.eup %1593  ;;  %v973_v21 = vmul.f32 %v1379_v15, %v2111_v52  ;;  %v1344_v20 = vunpack.c.h.bf16 %v1342_v23  ;;  %v1375_v26 = vunpack.c.l.bf16 %v1374_v24  ;;  %v1376_v27 = vunpack.c.h.bf16 %v1374_v24  ;;  %v1010_v15 = vld [vmem:[#allocation14 + $0x38] sm:$0xff] }
 0x1ae   : > { %v810_v35 = vsel %vm2183_vm11, %v1592_v61, %v806_v46  ;;  %v818_v36 = vmul.f32 %v1594_v30, %v2153_v62  ;;  %vm823_vm14 = vweird.f32 %v1594_v30  ;;  %v1406_v61 = vld [vmem:[#allocation11 + $0x10] sm:$0xff]   ;;  %v975_v62 = vmul.f32 %v1383_v40, %v2111_v52 }
 0x1af   : > { %v815_v39 = vsel %vm812_vm12, %v814_v22, %v810_v35  ;;  %vm824_vm15 = vmor %vm822_vm13, %vm823_vm14  ;;  %v1351_v0 = vunpack.c.l.bf16 %v1406_v61  ;;  %v1352_v1 = vunpack.c.h.bf16 %v1406_v61  ;;  %v974_v22 = vmul.f32 %v1380_v16, %v2111_v52 }
 0x1b0   : > { %844 = vperm.xlu0 %1576, %v755_v14   ;;  %864 = vperm.xlu2 %1578, %v815_v39   ;;  %v819_v41 = vsub.f32 1.0, %v818_v36  ;;  %v989_v9 = vadd.f32 %v973_v21, %v921_v19  ;;  %v919_v28 = vmul.f32 %v1343_v25, %v2108_v50  ;;  %v920_v29 = vmul.f32 %v1344_v20, %v2108_v50 }
 0x1b1   : > { %1023 = vmatpush.bf16.msra.mxu1 %v1014_v51  ;;  %1451 = vmatpush.bf16.msra.mxu2 %v1014_v51  ;;  %v923_v4 = vmul.f32 %v1351_v0, %v2108_v50  ;;  %v924_v5 = vmul.f32 %v1352_v1, %v2108_v50  ;;  %v990_v46 = vadd.f32 %v974_v22, %v922_v59  ;;  %v1004_v0 = vld [vmem:[#allocation14 + $0x8] sm:$0xff] }
 0x1b2   : > { %v820_v48 = vmul.f32 %v1594_v30, %v819_v41  ;;  %v972_v14 = vmul.f32 %v1376_v27, %v2111_v52 }
 0x1b3   : > { %v991_v10 = vadd.f32 %v975_v62, %v923_v4  ;;  %v992_v11 = vadd.f32 %v976_v6, %v924_v5  ;;  %v1012_v31 = vpack.c.bf16 %v990_v46, %v989_v9  ;;  %v1006_v6 = vld [vmem:[#allocation14 + $0x18] sm:$0xff] }
 0x1b4   : > { %v821_v54 = vadd.f32 %v1594_v30, %v820_v48  ;;  %v988_v33 = vadd.f32 %v972_v14, %v920_v29 }
 0x1b5   : > { %v1013_v18 = vpack.c.bf16 %v992_v11, %v991_v10  ;;  %v1009_v11 = vld [vmem:[#allocation14 + $0x30] sm:$0xff] }
 0x1b6   : > { %v825_v55 = vsel %vm824_vm15, %v1594_v30, %v821_v54  ;;  %v971_v30 = vmul.f32 %v1375_v26, %v2111_v52 }
 0x1b7   : > { %v830_v57 = vsel %vm827_vm0, %v829_v53, %v825_v55  ;;  %1024 = vmatpush.bf16.msra.mxu1 %v1013_v18  ;;  %1452 = vmatpush.bf16.msra.mxu2 %v1013_v18 }
 0x1b8   : > { %869 = vperm.xlu2 %1578, %v830_v57   ;;  %v987_v32 = vadd.f32 %v971_v30, %v919_v28 }
 0x1ba   : > { %v1011_v35 = vpack.c.bf16 %v988_v33, %v987_v32 }
 0x1bb   : > { %1025 = vmatpush.bf16.msra.mxu1 %v1012_v31  ;;  %1453 = vmatpush.bf16.msra.mxu2 %v1012_v31 }
 0x1bf   : > { %1026 = vmatpush.bf16.msra.mxu1 %v1011_v35  ;;  %1454 = vmatpush.bf16.msra.mxu2 %v1011_v35 }
 0x1fc   : > { %v835_v36 = vpop.permute.xlu1 %834 }
 0x1fd   : > { %v872_v39 = vmul.f32 %v835_v36, %v2049_v56 }
 0x204   : > { %v840_v37 = vpop.permute.xlu1 %839 }
 0x205   : > { %v873_v42 = vmul.f32 %v840_v37, %v2057_v60 }
 0x207   : > { %v880_v43 = vpack.c.bf16 %v873_v42, %v872_v39 }
 0x209   : > { %1027 = vmatmul.bf16.vlgmr.msra.gmra.mxu1 %v880_v43 }
 0x20a   : > { %v865_v45 = vpop.permute.xlu2 %864 }
 0x20b   : > { %v878_v57 = vmul.f32 %v865_v45, %v2116_v7  ;;  %v1008_v7 = vld [vmem:[#allocation14 + $0x28] sm:$0xff] }
 0x20c   : > { %v850_v48 = vpop.permute.xlu1 %849 }
 0x20d   : > { %v875_v53 = vmul.f32 %v850_v48, %v2061_v3  ;;  %v1007_v3 = vld [vmem:[#allocation14 + $0x20] sm:$0xff] }
 0x212   : > { %v855_v50 = vpop.permute.xlu0 %854  ;;  %v870_v60 = vpop.permute.xlu2 %869 }
 0x213   : > { %v876_v52 = vmul.f32 %v855_v50, %v2069_v17  ;;  %v879_v55 = vmul.f32 %v870_v60, %v2143_v49 }
 0x215   : > { %v883_v17 = vpack.c.bf16 %v879_v55, %v878_v57 }
 0x21a   : > { %v860_v44 = vpop.permute.xlu0 %859 }
 0x21b   : > { %v877_v41 = vmul.f32 %v860_v44, %v2082_v34  ;;  %v1003_v34 = vld [vmem:[#allocation14] sm:$0xff] }
 0x21d   : > { %v882_v47 = vpack.c.bf16 %v877_v41, %v876_v52 }
 0x21f   : > { %1037 = vmatmul.bf16.vlgmr.msra.gmra.mxu2 %v882_v47 }
 0x222   : > { %v845_v51 = vpop.permute.xlu0 %844 }
 0x223   : > { %v874_v56 = vmul.f32 %v845_v51, %v2052_v58 }
 0x225   : > { %v881_v54 = vpack.c.bf16 %v875_v53, %v874_v56 }
 0x227   : > { %1032 = vmatmul.bf16.gmra.mxu1 %v881_v54 }
 0x22f   : > { %1042 = vmatmul.bf16.gmra.mxu2 %v883_v17 }
 0x286   : > { %v1028_v61 = vpop.f32.mrf.mxu1 }
 0x287   : > { %v1048_v63 = vadd.f32 %v1028_v61, %v1003_v34 }
 0x289   : > { %1056 = vst [vmem:[#allocation14] sm:$0xff] %v1048_v63 }
 0x28e   : > { %v1030_v1 = vpop.f32.mrf.mxu1 }
 0x28f   : > { %v1049_v40 = vadd.f32 %v1030_v1, %v1004_v0 }
 0x290   : > { %v1069_v19 = vld [vmem:[#allocation14] sm:$0xff] (%p1064_p1) }
 0x291   : > { %1057 = vst [vmem:[#allocation14 + $0x8] sm:$0xff] %v1049_v40  ;;  %v1077_v22 = vmax.f32 (%p1064_p1), %v1069_v19, 0.0 }
 0x293   : > { %1085 = vst [vmem:[#allocation14] sm:$0xff] (%p1064_p1), %v1077_v22 }
 0x298   : > { %v1070_v59 = vld [vmem:[#allocation14 + $0x8] sm:$0xff] (%p1064_p1) }
 0x299   : > { %v1078_v23 = vmax.f32 (%p1064_p1), %v1070_v59, 0.0 }
 0x29b   : > { %1086 = vst [vmem:[#allocation14 + $0x8] sm:$0xff] (%p1064_p1), %v1078_v23 }
 0x2a2   : > { %v1038_v58 = vpop.f32.mrf.mxu2 }
 0x2a3   : > { %v1052_v4 = vadd.f32 %v1038_v58, %v1007_v3 }
 0x2a4   : > { %v1033_v5 = vpop.f32.mrf.mxu1 }
 0x2a5   : > { %1060 = vst [vmem:[#allocation14 + $0x20] sm:$0xff] %v1052_v4  ;;  %v1050_v49 = vadd.f32 %v1033_v5, %v1005_v2 }
 0x2a7   : > { %1058 = vst [vmem:[#allocation14 + $0x10] sm:$0xff] %v1050_v49 }
 0x2aa   : > { %v1040_v62 = vpop.f32.mrf.mxu2 }
 0x2ab   : > { %v1053_v38 = vadd.f32 %v1040_v62, %v1008_v7 }
 0x2ac   : > { %v1035_v8 = vpop.f32.mrf.mxu1  ;;  %v1073_v20 = vld [vmem:[#allocation14 + $0x20] sm:$0xff] (%p1064_p1) }
 0x2ad   : > { %1061 = vst [vmem:[#allocation14 + $0x28] sm:$0xff] %v1053_v38  ;;  %v1051_v10 = vadd.f32 %v1035_v8, %v1006_v6  ;;  %v1081_v46 = vmax.f32 (%p1064_p1), %v1073_v20, 0.0 }
 0x2ae   : > { %v1071_v21 = vld [vmem:[#allocation14 + $0x10] sm:$0xff] (%p1064_p1) }
 0x2af   : > { %1059 = vst [vmem:[#allocation14 + $0x18] sm:$0xff] %v1051_v10  ;;  %v1079_v24 = vmax.f32 (%p1064_p1), %v1071_v21, 0.0 }
 0x2b0   : > { %1089 = vst [vmem:[#allocation14 + $0x20] sm:$0xff] (%p1064_p1), %v1081_v46 }
 0x2b1   : > { %1087 = vst [vmem:[#allocation14 + $0x10] sm:$0xff] (%p1064_p1), %v1079_v24 }
 0x2b2   : > { %v1043_v12 = vpop.f32.mrf.mxu2 }
 0x2b3   : > { %v1054_v13 = vadd.f32 %v1043_v12, %v1009_v11 }
 0x2b4   : > { %v1074_v26 = vld [vmem:[#allocation14 + $0x28] sm:$0xff] (%p1064_p1) }
 0x2b5   : > { %1062 = vst [vmem:[#allocation14 + $0x30] sm:$0xff] %v1054_v13  ;;  %v1082_v29 = vmax.f32 (%p1064_p1), %v1074_v26, 0.0 }
 0x2b6   : > { %v1072_v25 = vld [vmem:[#allocation14 + $0x18] sm:$0xff] (%p1064_p1) }
 0x2b7   : > { %v1080_v27 = vmax.f32 (%p1064_p1), %v1072_v25, 0.0  ;;  %1090 = vst [vmem:[#allocation14 + $0x28] sm:$0xff] (%p1064_p1), %v1082_v29 }
 0x2b9   : > { %1068 = sbr.rel (!%p1064_p1) target bundleno = 712 (0x2c8), region = 88  ;;  %1088 = vst [vmem:[#allocation14 + $0x18] sm:$0xff] (%p1064_p1), %v1080_v27 }
 0x2ba   : > { %v1045_v16 = vpop.f32.mrf.mxu2 }
 0x2bb   : > { %v1055_v18 = vadd.f32 %v1045_v16, %v1010_v15 }
 0x2bc   : > { %v1075_v9 = vld [vmem:[#allocation14 + $0x30] sm:$0xff] (%p1064_p1) }
 0x2bd   : > { %1063 = vst [vmem:[#allocation14 + $0x38] sm:$0xff] %v1055_v18  ;;  %v1083_v30 = vmax.f32 (%p1064_p1), %v1075_v9, 0.0 }
 0x2bf   : > { %1091 = vst [vmem:[#allocation14 + $0x30] sm:$0xff] %v1083_v30 }
 0x2c4   : > { %v1076_v28 = vld [vmem:[#allocation14 + $0x38] sm:$0xff] }
 0x2c5   : > { %v1084_v14 = vmax.f32 %v1076_v28, 0.0 }
 0x2c7   : > { %1092 = vst [vmem:[#allocation14 + $0x38] sm:$0xff] %v1084_v14 }
 0x2c8 PF: > { %s2277_s27 = sadd.s32 4294967295, %s1854_s29   ;;  %s1103_s23 = sshll.u32 %s2256_s7, 4  ;;  %s1104_s23 = int_to_ptr.hbm [resolvable:$true] %s1103_s23 }
 0x2c9   : > { %p1512_p3 = scmp.eq.s32.totalorder %s2277_s27, 3  ;;  %s1866_s30 = smov [#allocation14]  }
 0x2ca   : > { %s1101_s8 = sshll.u32 %s1866_s30, 4  ;;  %s1867_s24 = smov 128   ;;  %s1102_s8 = int_to_ptr.vmem [resolvable:$true] %s1101_s8 }
 0x2cb   : > { %s1868_s16 = smov 8  }
 0x2cc   : > { %1478 = dma.vmem_to_hbm [thread:$0]  (%p1512_p3), %s1102_s8, 1024, %s1104_s23, [#allocation5], %s1867_s24, %s1867_s24, %s1868_s16  }
 0x2cd   : > { %1829 = dma.done.wait (%p1512_p3), [#allocation5], 1024  }
 0x2ce   : > { %1831 = vsyncadd (%p1512_p3), [#allocation5], 4294966272 }
 0x2cf PF: > { %s24_s29 = sadd.s32 1, %s1854_s29   ;;  %s2278_s24 = smov %s1838_s25 }
 0x2d0   : > { %p21_p4 = scmp.ge.s32.totalorder %s24_s29, 6   ;;  %s2279_s25 = smov %s1842_s26 }
 0x2d1   : > { %s2280_s26 = smov %s2010_s9  ;;  %s2281_s27 = smov %s1850_s28 }
 0x2d2   : > { %s2282_s28 = smov %s2284_s13  ;;  %23 = sbr.rel (!%p21_p4) target bundleno = 10 (0xa), region = 126 }
 0x2d7   :  { %1120 = vsyncpa [#allocation4], 1 }
 0x2d8   :  { %1122 = vsyncpa [#allocation4 + $0x1], 1 }
 0x2d9   :  { %1123 = vsyncpa [#allocation9], 1 }
 0x2da   :  { %1124 = vsyncpa [#allocation12], 1 }
 0x2db   :  { %1125 = vsyncpa [#allocation5], 1 }
 0x2dc   :  { %1127 = vsyncpa [#allocation5 + $0x1], 1 }
 0x2dd   :  { %1128 = vsyncpa [#allocation6], 1 }
 0x2de   :  { %1130 = vsyncpa [#allocation6 + $0x1], 1 }

</bundles_post_ra>
